<compile_context>
chip_gen: v7x
topology: tpu7x:2x2x1
jax: 0.10.0
libtpu: 0.0.40
codegen_flags: <defaults>
</compile_context>

<pallas_src>
import jax
import jax.numpy as jnp
from jax.experimental import pallas as pl
from jax.experimental.pallas import tpu as pltpu

D_MODEL = 32     # hidden size fed into the generator
VOCAB = 128      # vocab size (lane-dense: multiple of 128)
TILE_M = 512     # max rows per grid step (multiple of 16 for bf16 sublanes)


def _round_up(x, m):
    return (x + m - 1) // m * m


# ----------------------------- Pallas kernel -----------------------------

def _generator_kernel(x_ref, w_ref, b_ref, o_ref):
    # x:[TM, D] bf16   w:[D, V] bf16   b:[1, V] f32   ->   o:[TM, V] f32
    # logits = x @ w + b, accumulated in f32 on the MXU
    logits = jnp.dot(x_ref[...], w_ref[...],
                     preferred_element_type=jnp.float32) + b_ref[...]
    # numerically stable log-softmax over the last (lane) dim, all in f32
    m = jnp.max(logits, axis=-1, keepdims=True)
    z = logits - m
    lse = jnp.log(jnp.sum(jnp.exp(z), axis=-1, keepdims=True))
    o_ref[...] = (z - lse).astype(o_ref.dtype)


def generator_forward(x, w, b, *, tile_m=TILE_M):
    """x:[B, S, D] float32, w:[D, V] (pre-transposed nn.Linear weight), b:[V]."""
    B, S, D = x.shape
    V = w.shape[1]
    M = B * S

    # Adaptive row tile: big enough to amortize per-step overhead, capped at
    # tile_m so v7x keeps >=2 grid steps for realistic M and VMEM stays small
    # (~6 * tm * 128 * 4B working set even at tm=512 is ~1.5 MiB).
    tm = min(tile_m, _round_up(M, 16))
    M_pad = _round_up(M, tm)

    x2 = x.reshape(M, D)
    if M_pad != M:
        # pad rows with zeros; log_softmax of a zero row is finite and gets
        # sliced off below, so no masking is needed inside the kernel.
        x2 = jnp.pad(x2, ((0, M_pad - M), (0, 0)))

    # bf16 matmul operands (MXU-native), f32 bias.
    x_bf16 = x2.astype(jnp.bfloat16)
    w_bf16 = w.astype(jnp.bfloat16)
    b_f32 = b.astype(jnp.float32).reshape(1, V)

    out = pl.pallas_call(
        _generator_kernel,
        out_shape=jax.ShapeDtypeStruct((M_pad, V), jnp.float32),
        grid=(M_pad // tm,),
        in_specs=[
            pl.BlockSpec((tm, D), lambda i: (i, 0)),   # activation rows
            pl.BlockSpec((D, V), lambda i: (0, 0)),    # full weight, resident
            pl.BlockSpec((1, V), lambda i: (0, 0)),    # bias row, resident
        ],
        out_specs=pl.BlockSpec((tm, V), lambda i: (i, 0)),
        compiler_params=pltpu.CompilerParams(
            # row tiles are independent -> shard across v7x's 2 TensorCores
            dimension_semantics=("parallel",),
        ),
    )(x_bf16, w_bf16, b_f32)

    return out[:M].reshape(B, S, V)


# --------------------------------- main ---------------------------------

if __name__ == "__main__":
    key = jax.random.PRNGKey(0)
    kx, kw, kb = jax.random.split(key, 3)

    B, S = 2, 8                       # batch, sequence length
    x = jax.random.normal(kx, (B, S, D_MODEL), jnp.float32)

    # PyTorch nn.Linear(d_model, vocab): weight [V, D], y = x @ weight.T + bias
    weight = jax.random.normal(kw, (VOCAB, D_MODEL), jnp.float32) * 0.05
    bias = jax.random.normal(kb, (VOCAB,), jnp.float32) * 0.01
    w = weight.T                      # [D, V] for the fused kernel

    out = generator_forward(x, w, bias)
    out = jax.block_until_ready(out)

    # reference check against plain JAX (same semantics as the PyTorch module);
    # tolerance loosened because the contraction operands are bf16.
    ref = jax.nn.log_softmax(x @ w + bias, axis=-1)

    assert out.shape == (B, S, VOCAB) and out.dtype == jnp.float32
    assert bool(jnp.all(jnp.isfinite(out)))
    assert bool(jnp.allclose(out, ref, atol=2e-2, rtol=2e-2))
    # log-probs must normalize: logsumexp over vocab == 0
    assert bool(jnp.allclose(jax.nn.logsumexp(out, axis=-1),
                             jnp.zeros((B, S)), atol=1e-4))
    print("KERNEL_OK")
</pallas_src>

<mosaic_0001>
module attributes {stable_mosaic.version = 11 : i64} {
  func.func @_generator_kernel(%arg0: i32, %arg1: memref<16x32xbf16, #tpu.memory_space<vmem>>, %arg2: memref<32x128xbf16, #tpu.memory_space<vmem>>, %arg3: memref<1x128xf32, #tpu.memory_space<vmem>>, %arg4: memref<16x128xf32, #tpu.memory_space<vmem>>) attributes {dimension_semantics = [#tpu.dimension_semantics<parallel>], iteration_bounds = array<i64: 1>, scalar_prefetch = 0 : i64, scratch_operands = 0 : i64, tpu.core_type = #tpu.core_type<tc>, window_params = [{transform_indices = @transform_0, window_bounds = array<i64: 16, 32>}, {pipeline_mode = #tpu.pipeline_mode<synchronous>, transform_indices = @transform_1, window_bounds = array<i64: 32, 128>}, {pipeline_mode = #tpu.pipeline_mode<synchronous>, transform_indices = @transform_2, window_bounds = array<i64: 1, 128>}, {transform_indices = @transform_3, window_bounds = array<i64: 16, 128>}]} {
    %c0 = arith.constant 0 : index
    %c0_0 = arith.constant 0 : index
    %0 = vector.load %arg1[%c0, %c0_0] : memref<16x32xbf16, #tpu.memory_space<vmem>>, vector<16x32xbf16>
    %c0_1 = arith.constant 0 : index
    %c0_2 = arith.constant 0 : index
    %1 = vector.load %arg2[%c0_1, %c0_2] : memref<32x128xbf16, #tpu.memory_space<vmem>>, vector<32x128xbf16>
    %cst = arith.constant dense<0.000000e+00> : vector<16x128xf32>
    %2 = tpu.matmul %0, %1, %cst {dimension_numbers = #tpu.dot_dimension_numbers<[1], [0], [0], [1], [0, 0, 1, 1], [], []>} : vector<16x32xbf16>, vector<32x128xbf16>, vector<16x128xf32> -> vector<16x128xf32>
    %c0_3 = arith.constant 0 : index
    %c0_4 = arith.constant 0 : index
    %3 = vector.load %arg3[%c0_3, %c0_4] : memref<1x128xf32, #tpu.memory_space<vmem>>, vector<1x128xf32>
    %4 = vector.broadcast %3 : vector<1x128xf32> to vector<16x128xf32>
    %5 = arith.addf %2, %4 : vector<16x128xf32>
    %cst_5 = arith.constant dense<0xFF800000> : vector<16xf32>
    %6 = vector.multi_reduction <maximumf>, %5, %cst_5 [1] : vector<16x128xf32> to vector<16xf32>
    %7 = vector.shape_cast %6 : vector<16xf32> to vector<16x1xf32>
    %8 = vector.broadcast %7 : vector<16x1xf32> to vector<16x128xf32>
    %9 = arith.subf %5, %8 : vector<16x128xf32>
    %10 = math.exp %9 : vector<16x128xf32>
    %cst_6 = arith.constant dense<0.000000e+00> : vector<16xf32>
    %11 = vector.multi_reduction <add>, %10, %cst_6 [1] : vector<16x128xf32> to vector<16xf32>
    %12 = vector.shape_cast %11 : vector<16xf32> to vector<16x1xf32>
    %13 = math.log %12 : vector<16x1xf32>
    %14 = vector.broadcast %13 : vector<16x1xf32> to vector<16x128xf32>
    %15 = arith.subf %9, %14 : vector<16x128xf32>
    %c0_7 = arith.constant 0 : index
    %c0_8 = arith.constant 0 : index
    %16 = vector.load %arg4[%c0_7, %c0_8] : memref<16x128xf32, #tpu.memory_space<vmem>>, vector<16x128xf32>
    tpu.vector_store %arg4[%c0_7, %c0_8], %15 {strides = array<i32>} : memref<16x128xf32, #tpu.memory_space<vmem>>, vector<16x128xf32>,
    return
  }
  func.func @transform_0(%arg0: i32) -> (i32, i32) {
    %c0_i32 = arith.constant 0 : i32
    %c0_i32_0 = arith.constant 0 : i32
    return %arg0, %c0_i32 : i32, i32
  }
  func.func @transform_1(%arg0: i32) -> (i32, i32) {
    %c0_i32 = arith.constant 0 : i32
    %c0_i32_0 = arith.constant 0 : i32
    %c0_i32_1 = arith.constant 0 : i32
    return %c0_i32, %c0_i32_0 : i32, i32
  }
  func.func @transform_2(%arg0: i32) -> (i32, i32) {
    %c0_i32 = arith.constant 0 : i32
    %c0_i32_0 = arith.constant 0 : i32
    %c0_i32_1 = arith.constant 0 : i32
    return %c0_i32, %c0_i32_0 : i32, i32
  }
  func.func @transform_3(%arg0: i32) -> (i32, i32) {
    %c0_i32 = arith.constant 0 : i32
    %c0_i32_0 = arith.constant 0 : i32
    return %arg0, %c0_i32 : i32, i32
  }
}

</mosaic_0001>

<bundles_post_ra>
// kernel: tpu_custom_call.1
= control target key start
LH: loop header
LB: loop body
LE: loop exit
PB: predicated region body
PF: predicated region fallthrough
CT: control target
= control target key end

     0   :  { %8 = vsyncpa [#allocation3], 0  ;;  %s335_s0 = inlined_call_operand.hbm [shape: bf16[16,32], index: 0, kind: input, shape index: {}]   ;;  %s336_s1 = inlined_call_operand.hbm [shape: bf16[32,128], index: 1, kind: input, shape index: {}]   ;;  %s337_s2 = inlined_call_operand.vmem [shape: f32[1,128], index: 2, kind: input, shape index: {}]   ;;  %s338_s3 = inlined_call_operand.hbm [shape: f32[16,128], index: 3, kind: output, shape index: {}]  }
   0x1   :  { %9 = vsyncpa [#allocation6], 0 }
   0x2   :  { %10 = vsyncpa [#allocation4], 0  ;;  %s267_s12 = smov [#allocation2]   ;;  %s195_s16 = scalar_lea.hbm %s335_s0, 128 }
   0x3   :  { %s16_s13 = sshll.u32 %s267_s12, 4  ;;  %p196_p0 = scmp.ne.s32.totalorder %s335_s0, %s195_s16  ;;  %s17_s13 = int_to_ptr.vmem [resolvable:$true] %s16_s13 }
   0x4   :  { %p199_p1 = scmp.lt.u32.totalorder %s195_s16, %s335_s0 }
   0x6   :  { %p201_p2 = pnand %p199_p1, %p196_p0 }
   0x8   :  { %204 = shalt.err (!%p201_p2)
}
   0x9   :  { %s205_s21 = scalar_lea.vmem %s17_s13, 128  ;;  %p210_p4 = scmp.lt.s32.totalorder %s17_s13, %s17_s13 }
   0xa   :  { %p206_p3 = scmp.ne.s32.totalorder %s17_s13, %s205_s21  ;;  %p211_p5 = scmp.lt.s32.totalorder %s205_s21, %s205_s21 }
   0xc   :  { %p212_p6 = por %p211_p5, %p210_p4 }
   0xe   :  { %p213_p7 = pnand %p212_p6, %p206_p3 }
  0x10   :  { %216 = shalt.err (!%p213_p7)
}
  0x11   :  { %s268_s22 = smov 64   ;;  %s269_s23 = smov 4  }
  0x12   :  { %22 = dma.hbm_to_vmem [thread:$0]  %s335_s0, 128, %s17_s13, [#allocation3], %s268_s22, %s268_s22, %s269_s23  }
  0x13   :  { %s270_s26 = smov [#allocation5]   ;;  %s217_s30 = scalar_lea.hbm %s336_s1, 256 }
  0x14   :  { %s28_s27 = sshll.u32 %s270_s26, 4  ;;  %p218_p8 = scmp.ne.s32.totalorder %s336_s1, %s217_s30  ;;  %s29_s27 = int_to_ptr.vmem [resolvable:$true] %s28_s27 }
  0x15   :  { %p221_p9 = scmp.lt.u32.totalorder %s217_s30, %s336_s1 }
  0x17   :  { %p223_p10 = pnand %p221_p9, %p218_p8 }
  0x19   :  { %226 = shalt.err (!%p223_p10)
}
  0x1a   :  { %s227_s8 = scalar_lea.vmem %s29_s27, 256  ;;  %p232_p12 = scmp.lt.s32.totalorder %s29_s27, %s29_s27 }
  0x1b   :  { %p228_p11 = scmp.ne.s32.totalorder %s29_s27, %s227_s8  ;;  %p233_p13 = scmp.lt.s32.totalorder %s227_s8, %s227_s8 }
  0x1d   :  { %p234_p0 = por %p233_p13, %p232_p12 }
  0x1f   :  { %p235_p1 = pnand %p234_p0, %p228_p11 }
  0x21   :  { %238 = shalt.err (!%p235_p1)
}
  0x22   :  { %34 = dma.hbm_to_vmem [thread:$0]  %s336_s1, 256, %s29_s27, [#allocation6], %s268_s22, %s268_s22, %s269_s23  }
  0x23   :  { %261 = dma.done.wait [#allocation3], 128  }
  0x24   :  { %262 = vsyncadd [#allocation3], 4294967168 }
  0x25   :  { %263 = dma.done.wait [#allocation6], 256  }
  0x26   :  { %264 = vsyncadd [#allocation6], 4294967040  ;;  %v271_v0 = vmov 0.0   ;;  %vm272_vm0 = vmmov 0   ;;  %v184_v1 = vld [vmem:[#allocation5] sm:$0xff]   ;;  %v185_v2 = vld [vmem:[#allocation5 + $0x8] sm:$0xff]  }
  0x27   :  { %167 = vmatprep.subr.bf16.mxu0 %v271_v0  ;;  %171 = vmatprep.mubr.msk.bf16.mxu0 %vm272_vm0, %v271_v0  ;;  %v186_v3 = vld [vmem:[#allocation2] sm:$0xff]   ;;  %vm74_vm1 = vcmask 261120   ;;  %s273_s1 = smov [#allocation7]  }
  0x28   :  { %168 = vmatpush3.bf16.msra.mxu0 %v184_v1  ;;  %v159_v4 = vld [vmem:[%s337_s2] ss:$0 sm:$0xff]  ;;  %s146_s2 = sshll.u32 %s273_s1, 4  ;;  %s147_s2 = int_to_ptr.vmem [resolvable:$true] %s146_s2 }
  0x29   :  { %169 = vmatprep.subr.bf16.mxu0 %v271_v0  ;;  %s239_s12 = scalar_lea.vmem %s147_s2, 256  ;;  %p244_p3 = scmp.lt.s32.totalorder %s147_s2, %s147_s2 }
  0x2a   :  { %p240_p2 = scmp.ne.s32.totalorder %s147_s2, %s239_s12  ;;  %p245_p4 = scmp.lt.s32.totalorder %s239_s12, %s239_s12 }
  0x2c   :  { %170 = vmatpush3.bf16.msra.mxu0 %v185_v2  ;;  %p246_p5 = por %p245_p4, %p244_p3 }
  0x2e   :  { %p247_p6 = pnand %p246_p5, %p240_p2 }
  0x2f   :  { %172 = vmatmul.mubr.msk.bf16.vlgmr.msra.gmra.mrb[0].mxu0 %vm74_vm1, %v186_v3 }
 0x102   :  { %v112_v5 = vpop.f32.mrb[0].mxu0 }
 0x103   :  { %v113_v6 = vadd.f32 %v159_v4, %v112_v5  ;;  %v173_v7 = vpop.f32.mrb[1].mxu0 }
 0x104   :  { %v115_v8 = vpop.f32.mrb[2].mxu0 }
 0x105   :  { %119 = vmax.xlane.f32.xlu0 %v113_v6  ;;  %v174_v9 = vpop.f32.mrb[3].mxu0  ;;  %v116_v10 = vadd.f32 %v159_v4, %v115_v8 }
 0x109   :  { %121 = vmax.xlane.f32.xlu0 %v116_v10 }
 0x192   :  { %v120_v11 = vpop.xlane.xlu0 %119 }
 0x193   :  { %v123_v12 = vsub.f32 %v113_v6, %v120_v11 }
 0x195   :  { %v125_v13 = vmul.f32 1.442695, %v123_v12 }
 0x196   :  { %v122_v14 = vpop.xlane.xlu0 %121 }
 0x197   :  { %v124_v15 = vsub.f32 %v116_v10, %v122_v14  ;;  %187 = vpow2.f32 %v125_v13 }
 0x199   :  { %v127_v16 = vmul.f32 1.442695, %v124_v15 }
 0x19b   :  { %189 = vpow2.f32 %v127_v16 }
 0x1a1   :  { %v188_v17 = vpop.eup %187 }
 0x1a2   :  { %129 = vadd.xlane.f32.xlu1 %v188_v17 }
 0x1a5   :  { %v190_v18 = vpop.eup %189 }
 0x1a6   :  { %131 = vadd.xlane.f32.xlu1 %v190_v18 }
 0x22f   :  { %v130_v19 = vpop.xlane.xlu1 %129 }
 0x230   :  { %191 = vlog2.f32 %v130_v19 }
 0x233   :  { %v132_v20 = vpop.xlane.xlu1 %131 }
 0x234   :  { %193 = vlog2.f32 %v132_v20 }
 0x23a   :  { %v192_v21 = vpop.eup %191 }
 0x23b   :  { %v134_v22 = vmul.f32 0.6931472, %v192_v21 }
 0x23d   :  { %v137_v23 = vsub.f32 %v123_v12, %v134_v22 }
 0x23e   :  { %v194_v24 = vpop.eup %193 }
 0x23f   :  { %139 = vst [vmem:[#allocation7] sm:$0xff] %v137_v23  ;;  %v136_v25 = vmul.f32 0.6931472, %v194_v24 }
 0x241   :  { %v138_v26 = vsub.f32 %v124_v15, %v136_v25 }
 0x243   :  { %140 = vst [vmem:[#allocation7 + $0x8] sm:$0xff] %v138_v26 }
 0x244   :  { %250 = shalt.err (!%p247_p6)
}
 0x245   :  { %s251_s15 = scalar_lea.hbm %s338_s3, 256 }
 0x246   :  { %p252_p7 = scmp.ne.s32.totalorder %s338_s3, %s251_s15  ;;  %p255_p8 = scmp.lt.u32.totalorder %s251_s15, %s338_s3 }
 0x248   :  { %p257_p9 = pnand %p255_p8, %p252_p7 }
 0x24a   :  { %260 = shalt.err (!%p257_p9)
}
 0x24b   :  { %s274_s20 = smov 128   ;;  %s275_s21 = smov 8  }
 0x24c   :  { %152 = dma.vmem_to_hbm [thread:$0]  %s147_s2, 256, %s338_s3, [#allocation4], %s274_s20, %s274_s20, %s275_s21  }
 0x24d   :  { %265 = dma.done.wait [#allocation4], 256  }
 0x24e   :  { %266 = vsyncadd [#allocation4], 4294967040 }
 0x24f   :  { %156 = vsyncpa [#allocation3], 1 }
 0x250   :  { %157 = vsyncpa [#allocation6], 1 }
 0x251   :  { %158 = vsyncpa [#allocation4], 1 }

</bundles_post_ra>
